<compile_context>
chip_gen: v6e
topology: v6e:2x2x1
jax: 0.10.0
libtpu: 0.0.40
codegen_flags: <defaults>
</compile_context>

<pallas_src>
import math
import jax
import jax.numpy as jnp
from jax.experimental import pallas as pl
from jax.experimental.pallas import tpu as pltpu


def _round_up(x, m):
    return ((x + m - 1) // m) * m


# ---------------------------------------------------------------------------
# Kernels
# ---------------------------------------------------------------------------
def _fused_slab_kernel(x_ref, w_ref, b_ref, out_ref):
    # (tm, D) @ (D, N_pad) + (1, N_pad) -> (tm, N_pad); one MXU push for both heads.
    out_ref[...] = (
        jnp.dot(x_ref[...], w_ref[...], preferred_element_type=jnp.float32)
        + b_ref[...]
    ).astype(out_ref.dtype)


def _fused_split_kernel(x_ref, w_ref, b_ref, mean_ref, std_ref):
    # One fused matmul, then two lane-dense stores (L is a multiple of 128 here,
    # so both slices land on 128-lane boundaries and issue full, unmasked vst's).
    L = mean_ref.shape[-1]
    res = (
        jnp.dot(x_ref[...], w_ref[...], preferred_element_type=jnp.float32)
        + b_ref[...]
    )
    mean_ref[...] = res[:, :L].astype(mean_ref.dtype)
    std_ref[...] = res[:, L:].astype(std_ref.dtype)


# ---------------------------------------------------------------------------
# Parameter preparation (done ONCE at init, not per forward call)
# ---------------------------------------------------------------------------
def prepare_latent_parameterizer_params(w_mean, b_mean, w_std, b_std):
    """Fuse the mean/std heads into one (D, N) weight and (1, N) bias.

    w_mean / w_std: (D, L)   (PyTorch stores (L, D); pass the transpose)
    b_mean / b_std: (L,)
    The fused output dim is padded up to a lane multiple only when the heads are
    not already lane-aligned (L % 128 != 0)."""
    D, L = w_mean.shape
    N = 2 * L
    lane_dense = (L % 128 == 0)
    N_pad = N if lane_dense else _round_up(N, 128)

    w = jnp.concatenate([w_mean, w_std], axis=1)   # (D, 2L)
    b = jnp.concatenate([b_mean, b_std], axis=0)   # (2L,)
    if N_pad != N:
        w = jnp.pad(w, ((0, 0), (0, N_pad - N)))
        b = jnp.pad(b, (0, N_pad - N))
    return {"w": w, "b": b.reshape(1, N_pad), "L": L, "lane_dense": lane_dense}


# ---------------------------------------------------------------------------
# Forward
# ---------------------------------------------------------------------------
def latent_parameterizer(x, params, *, tm=512):
    """Returns (mean, std), each (B, L): the two nn.Linear heads computed by one
    fused Pallas matmul over a batch-tiled grid."""
    w, b, L, lane_dense = params["w"], params["b"], params["L"], params["lane_dense"]
    B, D = x.shape
    N_pad = w.shape[1]

    # Batch tile: big tiles for the mem-bound roofline, but cap so B >= 16 always
    # gives >= 2 grid steps (both v7x TensorCores get work under "parallel").
    tm_eff = min(tm, _round_up(B, 8))
    if B >= 16:
        tm_eff = min(tm_eff, _round_up(-(-B // 2), 8))
    grid = (pl.cdiv(B, tm_eff),)

    in_specs = [
        pl.BlockSpec((tm_eff, D), lambda i: (i, 0)),   # batch tile of x
        pl.BlockSpec((D, N_pad), lambda i: (0, 0)),    # fused weight (grid-invariant)
        pl.BlockSpec((1, N_pad), lambda i: (0, 0)),    # fused bias   (grid-invariant)
    ]
    # TODO(synk): for much larger D/L on v7x (64 MiB VMEM), single-buffer the resident
    # weight (pipeline_mode=pl.Buffered(1)), add a K grid axis + VMEM f32 accumulator,
    # and store the fused weight in bf16 to halve the dominant weight stream.

    if lane_dense:
        out_shape = (
            jax.ShapeDtypeStruct((B, L), x.dtype),
            jax.ShapeDtypeStruct((B, L), x.dtype),
        )
        out_specs = (
            pl.BlockSpec((tm_eff, L), lambda i: (i, 0)),
            pl.BlockSpec((tm_eff, L), lambda i: (i, 0)),
        )
        kernel = _fused_split_kernel
        out_bytes = 2 * B * L * 4
    else:
        out_shape = jax.ShapeDtypeStruct((B, N_pad), x.dtype)
        out_specs = pl.BlockSpec((tm_eff, N_pad), lambda i: (i, 0))
        kernel = _fused_slab_kernel
        out_bytes = B * N_pad * 4

    # VMEM budget: double-buffered x/out tiles + (double-buffered) resident w/b.
    vmem_need = 4 * (2 * tm_eff * D + 2 * (D * N_pad + N_pad) + 2 * tm_eff * N_pad)
    vmem_limit = int(min(max(vmem_need + (4 << 20), 16 << 20), 64 << 20))

    cost = pl.CostEstimate(
        flops=2 * B * D * N_pad,
        transcendentals=0,
        bytes_accessed=B * D * 4 + D * N_pad * 4 + N_pad * 4 + out_bytes,
    )

    out = pl.pallas_call(
        kernel,
        out_shape=out_shape,
        grid_spec=pltpu.PrefetchScalarGridSpec(
            num_scalar_prefetch=0,
            grid=grid,
            in_specs=in_specs,
            out_specs=out_specs,
        ),
        compiler_params=pltpu.CompilerParams(
            dimension_semantics=("parallel",),     # v7x: shard batch across 2 TCs
            vmem_limit_bytes=vmem_limit,
        ),
        cost_estimate=cost,
    )(x, w, b)

    if lane_dense:
        mean, std = out
        return mean, std
    mean = out[:, :L]
    std = out[:, L: 2 * L]
    return mean, std


def init_linear_params(key, in_dim, out_dim):
    """Deterministic init mimicking PyTorch nn.Linear default (uniform +-1/sqrt(in))."""
    kw, kb = jax.random.split(key)
    bound = 1.0 / math.sqrt(in_dim)
    # stored as (in_dim, out_dim) == transpose of PyTorch's (out_dim, in_dim)
    w = jax.random.uniform(kw, (in_dim, out_dim), jnp.float32, -bound, bound)
    b = jax.random.uniform(kb, (out_dim,), jnp.float32, -bound, bound)
    return w, b


if __name__ == "__main__":
    key = jax.random.PRNGKey(0)

    # --- Case 1: production shape (tiny heads -> padded-slab path, grid=(1,)) ---
    k_x, k_mean, k_std, key = jax.random.split(key, 4)
    batch, input_dimensions, latent_dimension = 8, 32, 16
    x = jax.random.normal(k_x, (batch, input_dimensions), jnp.float32)
    w_mean, b_mean = init_linear_params(k_mean, input_dimensions, latent_dimension)
    w_std, b_std = init_linear_params(k_std, input_dimensions, latent_dimension)
    params = prepare_latent_parameterizer_params(w_mean, b_mean, w_std, b_std)

    mean, std = latent_parameterizer(x, params)
    jax.block_until_ready((mean, std))
    ref_mean = x @ w_mean + b_mean
    ref_std = x @ w_std + b_std
    assert mean.shape == (batch, latent_dimension)
    assert std.shape == (batch, latent_dimension)
    assert jnp.allclose(mean, ref_mean, atol=1e-5, rtol=1e-5)
    assert jnp.allclose(std, ref_std, atol=1e-5, rtol=1e-5)

    # --- Case 2: lane-aligned heads + ragged batch (split-output path, 2 grid steps,
    #             partial last block -> exercises the no-x-pad path) ---
    k_x2, k_mean2, k_std2, key = jax.random.split(key, 4)
    batch2, in2, lat2 = 24, 64, 128
    x2 = jax.random.normal(k_x2, (batch2, in2), jnp.float32)
    w_mean2, b_mean2 = init_linear_params(k_mean2, in2, lat2)
    w_std2, b_std2 = init_linear_params(k_std2, in2, lat2)
    params2 = prepare_latent_parameterizer_params(w_mean2, b_mean2, w_std2, b_std2)

    mean2, std2 = latent_parameterizer(x2, params2)
    jax.block_until_ready((mean2, std2))
    ref_mean2 = x2 @ w_mean2 + b_mean2
    ref_std2 = x2 @ w_std2 + b_std2
    assert mean2.shape == (batch2, lat2)
    assert std2.shape == (batch2, lat2)
    assert jnp.allclose(mean2, ref_mean2, atol=1e-4, rtol=1e-4)
    assert jnp.allclose(std2, ref_std2, atol=1e-4, rtol=1e-4)

    # TODO(synk): at the production size (B=8, D=32, L=16) this op is launch-bound;
    # the real win is fusing this matmul+bias as an epilogue of the upstream kernel
    # that produces x (or letting XLA fuse the two tiny linears).
    print("KERNEL_OK")
</pallas_src>

<mosaic_0001>
module attributes {stable_mosaic.version = 11 : i64} {
  func.func @_fused_slab_kernel(%arg0: i32, %arg1: memref<8x32xf32, #tpu.memory_space<vmem>>, %arg2: memref<32x128xf32, #tpu.memory_space<vmem>>, %arg3: memref<1x128xf32, #tpu.memory_space<vmem>>, %arg4: memref<8x128xf32, #tpu.memory_space<vmem>>) attributes {dimension_semantics = [#tpu.dimension_semantics<parallel>], iteration_bounds = array<i64: 1>, scalar_prefetch = 0 : i64, scratch_operands = 0 : i64, tpu.core_type = #tpu.core_type<tc>, window_params = [{transform_indices = @transform_0, window_bounds = array<i64: 8, 32>}, {pipeline_mode = #tpu.pipeline_mode<synchronous>, transform_indices = @transform_1, window_bounds = array<i64: 32, 128>}, {pipeline_mode = #tpu.pipeline_mode<synchronous>, transform_indices = @transform_2, window_bounds = array<i64: 1, 128>}, {transform_indices = @transform_3, window_bounds = array<i64: 8, 128>}]} {
    %c0 = arith.constant 0 : index
    %c0_0 = arith.constant 0 : index
    %0 = vector.load %arg1[%c0, %c0_0] : memref<8x32xf32, #tpu.memory_space<vmem>>, vector<8x32xf32>
    %c0_1 = arith.constant 0 : index
    %c0_2 = arith.constant 0 : index
    %1 = vector.load %arg2[%c0_1, %c0_2] : memref<32x128xf32, #tpu.memory_space<vmem>>, vector<32x128xf32>
    %cst = arith.constant dense<0.000000e+00> : vector<8x128xf32>
    %2 = tpu.matmul %0, %1, %cst {dimension_numbers = #tpu.dot_dimension_numbers<[1], [0], [0], [1], [0, 0, 1, 1], [], []>} : vector<8x32xf32>, vector<32x128xf32>, vector<8x128xf32> -> vector<8x128xf32>
    %c0_3 = arith.constant 0 : index
    %c0_4 = arith.constant 0 : index
    %3 = vector.load %arg3[%c0_3, %c0_4] : memref<1x128xf32, #tpu.memory_space<vmem>>, vector<1x128xf32>
    %4 = vector.broadcast %3 : vector<1x128xf32> to vector<8x128xf32>
    %5 = arith.addf %2, %4 : vector<8x128xf32>
    %c0_5 = arith.constant 0 : index
    %c0_6 = arith.constant 0 : index
    %6 = vector.load %arg4[%c0_5, %c0_6] : memref<8x128xf32, #tpu.memory_space<vmem>>, vector<8x128xf32>
    tpu.vector_store %arg4[%c0_5, %c0_6], %5 {strides = array<i32>} : memref<8x128xf32, #tpu.memory_space<vmem>>, vector<8x128xf32>,
    return
  }
  func.func @transform_0(%arg0: i32) -> (i32, i32) {
    %c0_i32 = arith.constant 0 : i32
    %c0_i32_0 = arith.constant 0 : i32
    return %arg0, %c0_i32 : i32, i32
  }
  func.func @transform_1(%arg0: i32) -> (i32, i32) {
    %c0_i32 = arith.constant 0 : i32
    %c0_i32_0 = arith.constant 0 : i32
    %c0_i32_1 = arith.constant 0 : i32
    return %c0_i32, %c0_i32_0 : i32, i32
  }
  func.func @transform_2(%arg0: i32) -> (i32, i32) {
    %c0_i32 = arith.constant 0 : i32
    %c0_i32_0 = arith.constant 0 : i32
    %c0_i32_1 = arith.constant 0 : i32
    return %c0_i32, %c0_i32_0 : i32, i32
  }
  func.func @transform_3(%arg0: i32) -> (i32, i32) {
    %c0_i32 = arith.constant 0 : i32
    %c0_i32_0 = arith.constant 0 : i32
    return %arg0, %c0_i32 : i32, i32
  }
}

</mosaic_0001>

<bundles_post_ra>
// kernel: tpu_custom_call.1
= control target key start
LH: loop header
LB: loop body
LE: loop exit
PB: predicated region body
PF: predicated region fallthrough
CT: control target
= control target key end

     0   :  { %8 = vsyncpa [#allocation3], 0  ;;  %s274_s0 = inlined_call_operand.hbm [shape: f32[8,32], index: 0, kind: input, shape index: {}]   ;;  %s275_s1 = inlined_call_operand.hbm [shape: f32[32,128], index: 1, kind: input, shape index: {}]   ;;  %s276_s2 = inlined_call_operand.vmem [shape: f32[1,128], index: 2, kind: input, shape index: {}]   ;;  %s277_s3 = inlined_call_operand.hbm [shape: f32[8,128], index: 3, kind: output, shape index: {}]  }
   0x1   :  { %9 = vsyncpa [#allocation6], 0 }
   0x2   :  { %10 = vsyncpa [#allocation4], 0  ;;  %s235_s12 = smov [#allocation2]   ;;  %s236_s14 = smov [#allocation5]  }
   0x3   :  { %s17_s13 = sshll.u32 %s235_s12, 4  ;;  %s26_s15 = sshll.u32 %s236_s14, 4  ;;  %s18_s13 = int_to_ptr.vmem [resolvable:$true] %s17_s13  ;;  %s27_s15 = int_to_ptr.vmem [resolvable:$true] %s26_s15 }
   0x4   :  { %s177_s16 = scalar_lea.vmem %s18_s13, 128  ;;  %p182_p1 = scmp.lt.s32.totalorder %s18_s13, %s18_s13 }
   0x5   :  { %p178_p0 = scmp.ne.s32.totalorder %s18_s13, %s177_s16  ;;  %p183_p2 = scmp.lt.s32.totalorder %s177_s16, %s177_s16 }
   0x7   :  { %p184_p3 = por %p183_p2, %p182_p1 }
   0x9   :  { %p185_p4 = pnand %p184_p3, %p178_p0 }
   0xb   :  { %188 = shalt.err (!%p185_p4)
}
   0xc   :  { %20 = dma.hbm_to_vmem [thread:$0]  %s274_s0, 128, %s18_s13, [#allocation3]  }
   0xd   :  { %s197_s19 = scalar_lea.vmem %s27_s15, 512  ;;  %p202_p6 = scmp.lt.s32.totalorder %s27_s15, %s27_s15 }
   0xe   :  { %p198_p5 = scmp.ne.s32.totalorder %s27_s15, %s197_s19  ;;  %p203_p7 = scmp.lt.s32.totalorder %s197_s19, %s197_s19 }
  0x10   :  { %p204_p8 = por %p203_p7, %p202_p6 }
  0x12   :  { %p205_p9 = pnand %p204_p8, %p198_p5 }
  0x14   :  { %208 = shalt.err (!%p205_p9)
}
  0x15   :  { %s237_s20 = smov 128   ;;  %s238_s21 = smov 8  }
  0x16   :  { %32 = dma.hbm_to_vmem [thread:$0]  %s275_s1, 512, %s27_s15, [#allocation6], %s237_s20, %s237_s20, %s238_s21  }
  0x17   :  { %229 = dma.done.wait [#allocation3], 128  }
  0x18   :  { %230 = vsyncadd [#allocation3], 4294967168 }
  0x19   :  { %231 = dma.done.wait [#allocation6], 512  }
  0x1a   :  { %232 = vsyncadd [#allocation6], 4294966784  ;;  %v239_v0 = vmov 0.0   ;;  %vm240_vm0 = vmmov 0   ;;  %v45_v1 = vld [vmem:[#allocation5 + $0x18] sm:$0xff]  ;;  %v44_v2 = vld [vmem:[#allocation5 + $0x10] sm:$0xff] }
  0x1b   :  { %151 = vmatprep.subr.mxu0 %v239_v0  ;;  %159 = vmatprep.mubr.msk.f32.mxu0 %vm240_vm0, %v239_v0  ;;  %v43_v3 = vld [vmem:[#allocation5 + $0x8] sm:$0xff]  ;;  %v42_v4 = vld [vmem:[#allocation5] sm:$0xff]  ;;  %v41_v5 = vld [vmem:[#allocation2] sm:$0xff]  ;;  %vm53_vm1 = vcmask 261120   ;;  %s241_s24 = smov [#allocation7]  }
  0x1c   :  { %152 = vmatpush3.msra.mxu0 %v45_v1  ;;  %v144_v6 = vld [vmem:[%s276_s2] ss:$0 sm:$0xff]  ;;  %s134_s25 = sshll.u32 %s241_s24, 4  ;;  %s135_s25 = int_to_ptr.vmem [resolvable:$true] %s134_s25 }
  0x1d   :  { %153 = vmatprep.subr.mxu0 %v239_v0  ;;  %s209_s26 = scalar_lea.vmem %s135_s25, 128  ;;  %p214_p11 = scmp.lt.s32.totalorder %s135_s25, %s135_s25 }
  0x1e   :  { %154 = vmatpush3.msra.mxu0 %v44_v2  ;;  %p210_p10 = scmp.ne.s32.totalorder %s135_s25, %s209_s26  ;;  %p215_p12 = scmp.lt.s32.totalorder %s209_s26, %s209_s26 }
  0x1f   :  { %155 = vmatprep.subr.mxu0 %v239_v0 }
  0x20   :  { %156 = vmatpush3.msra.mxu0 %v43_v3  ;;  %p216_p13 = por %p215_p12, %p214_p11 }
  0x21   :  { %157 = vmatprep.subr.mxu0 %v239_v0 }
  0x22   :  { %158 = vmatpush3.msra.mxu0 %v42_v4  ;;  %p217_p0 = pnand %p216_p13, %p210_p10 }
  0x23   :  { %160 = vmatmul.mubr.msk.f32.vlgmr.msra.gmra.mxu0 %vm53_vm1, %v41_v5 }
  0xe3   :  { %v123_v7 = vpop.f32.mrf.mxu0 }
  0xe4   :  { %v124_v8 = vadd.f32 %v144_v6, %v123_v7 }
  0xe5   :  { %v161_v9 = vpop.f32.mrf.mxu0 }
  0xe6   :  { %127 = vst [vmem:[#allocation7] sm:$0xff] %v124_v8 }
  0xe7   :  { %220 = shalt.err (!%p217_p0)
}
  0xe8   :  { %137 = dma.vmem_to_hbm [thread:$0]  %s135_s25, 128, %s277_s3, [#allocation4]  }
  0xe9   :  { %233 = dma.done.wait [#allocation4], 128  }
  0xea   :  { %234 = vsyncadd [#allocation4], 4294967168 }
  0xeb   :  { %141 = vsyncpa [#allocation3], 1 }
  0xec   :  { %142 = vsyncpa [#allocation6], 1 }
  0xed   :  { %143 = vsyncpa [#allocation4], 1 }

</bundles_post_ra>
